<compile_context>
chip_gen: v7x
topology: tpu7x:2x2x1
jax: 0.10.0
libtpu: 0.0.40
codegen_flags: <defaults>
</compile_context>

<pallas_src>
import functools

import jax
import jax.numpy as jnp
from jax import lax
from jax.experimental import pallas as pl
from jax.experimental.pallas import tpu as pltpu

D = 50          # embedding dim (hard-coded in the module)
K = 5           # kernel_size;  kernel_num = Ci = 1 -> single in/out channel

_LANES = 128
_SUBLANES = 8
# Padded-VMEM budget for ONE x input buffer (the pipeline double-buffers it).
# Padded bytes of a (TB, Lp, 50) f32 block = TB * Lp * 128 * 4.
_TILE_PADDED_BYTES = 8 * 1024 * 1024
# TODO(synk): per-generation tuning -- v5e/v6e could take 2-4x larger tiles and a
# higher vmem limit; this single static budget targets the v7x 64 MiB VMEM floor.


def cnn_text_kernel(x_ref, w_ref, b_ref, o_ref, *, valid_t):
    # x_ref: (TB, Lp, D) VMEM   w_ref: (K, D) VMEM   b_ref: (1, 1) SMEM   o_ref: (TB, 1) VMEM
    tb, lp, d = x_ref.shape
    kk = w_ref.shape[0]

    # Free view: Lp % 8 == 0 and the minor (lane) dim is unchanged.
    x2 = x_ref[...].reshape(tb * lp, d)

    # MXU: (K, D) x (TB*Lp, D)^T -> (K, TB*Lp).  M = 5 (tiny), N = TB*Lp (lane-dense),
    # f32 accumulation.  NT form keeps x2 in its natural layout.
    s = lax.dot_general(
        w_ref[...], x2,
        dimension_numbers=(((1,), (1,)), ((), ())),
        preferred_element_type=jnp.float32,
    )
    # Split the flat row axis back into (batch, time): K small (TB, Lp) slabs.
    s = s.reshape(kk, tb, lp)

    # conv[b, t] = sum_k S[k, b, t + k],  t < valid_t.  Static lane-offset slices
    # (single lane-rotates) + adds; everything stays lane-dense and no (TB, T, K)
    # accumulator is ever materialized.
    conv = s[0, :, 0:valid_t]
    for k in range(1, kk):
        conv = conv + s[k, :, k:k + valid_t]

    # relu(conv + bias); .mean(3) over the width-1 conv axis is an identity.
    y = jnp.maximum(conv + b_ref[0, 0], 0.0)                 # (TB, T)
    # max_pool1d over the whole valid time axis; dropout is identity at inference.
    o_ref[...] = jnp.max(y, axis=1, keepdims=True)           # (TB, 1)
    # TODO(synk): fc1 (Linear(1, 1)) exists in __init__ but is unused in forward; not applied.


def _round_up(v, m):
    return (v + m - 1) // m * m


def _pick_batch_tile(batch, lp):
    """Largest multiple-of-8 batch tile whose PADDED (TB, Lp, 50->128) block fits budget."""
    padded_row_bytes = lp * _LANES * 4               # D=50 lanes pad to 128, f32
    tb = (_TILE_PADDED_BYTES // padded_row_bytes) // _SUBLANES * _SUBLANES
    tb = max(tb, _SUBLANES)
    return min(tb, _round_up(batch, _SUBLANES))
    # TODO(synk): for very long L (TB pinned at 8 and still over budget) add an
    # "arbitrary" L-chunk grid axis with a running-max scratch and a K-1 row halo.


def cnn_text_forward(x, w, b):
    B, L, Dx = x.shape
    assert Dx == D and L >= K
    T = L - K + 1                                    # valid conv output length

    Lp = _round_up(L, _SUBLANES)                     # sublane-align: in-kernel flatten is free
    TB = _pick_batch_tile(B, Lp)
    Bp = _round_up(B, TB)
    if (Bp, Lp) != (B, L):                           # zero padding; never read by valid windows
        x = jnp.pad(x, ((0, Bp - B), (0, Lp - L), (0, 0)))

    kernel = functools.partial(cnn_text_kernel, valid_t=T)
    out = pl.pallas_call(
        kernel,
        out_shape=jax.ShapeDtypeStruct((Bp, 1), jnp.float32),
        grid=(Bp // TB,),
        in_specs=[
            pl.BlockSpec((TB, Lp, D), lambda i: (i, 0, 0)),        # streamed batch tile
            pl.BlockSpec((K, D), lambda i: (0, 0)),                # resident weight
            pl.BlockSpec(memory_space=pltpu.MemorySpace.SMEM),     # bias scalar
        ],
        out_specs=pl.BlockSpec((TB, 1), lambda i: (i, 0)),
        compiler_params=pltpu.CompilerParams(
            # TODO(synk): on v7x, pltpu.CORE_PARALLEL (or pl.core_map over a 2-TC
            # mesh) would shard the batch grid over both TensorCores; kept
            # "parallel" here for portability across generations.
            dimension_semantics=("parallel",),
            # Padding-aware worst case: 2 x 8 MiB double-buffered x tiles plus
            # <~16 MiB of matmul-result / relayout / reduction temporaries ->
            # comfortably under 48 MiB, which leaves headroom inside v7x's 64 MiB.
            vmem_limit_bytes=48 * 1024 * 1024,
        ),
        cost_estimate=pl.CostEstimate(
            flops=2 * B * T * K * D,
            transcendentals=0,
            bytes_accessed=(B * L * D + K * D + B) * 4,
        ),
    )(x, w, b)
    return out[:B, 0]                                # drop padding, squeeze(-1) -> (B,)


def ref_forward(x, w, b):
    # Pure-JAX reference for verification.
    B, L, _ = x.shape
    T = L - K + 1
    windows = jnp.stack([x[:, k:k + T, :] for k in range(K)], axis=2)  # (B, T, K, D)
    conv = jnp.einsum("btkd,kd->bt", windows, w) + b[0, 0]
    return jnp.max(jnp.maximum(conv, 0.0), axis=1)


if __name__ == "__main__":
    B, L = 2, 16
    key = jax.random.PRNGKey(0)
    kx, kw, kb = jax.random.split(key, 3)

    x = jax.random.normal(kx, (B, L, D), dtype=jnp.float32)
    # Deterministic synthetic parameters (shapes from Conv2d(1, 1, (5, 50))).
    fan_in = K * D
    bound = (1.0 / fan_in) ** 0.5
    w = jax.random.uniform(kw, (K, D), minval=-bound, maxval=bound, dtype=jnp.float32)
    b = jax.random.uniform(kb, (1, 1), minval=-bound, maxval=bound, dtype=jnp.float32)

    out = jax.block_until_ready(cnn_text_forward(x, w, b))
    expected = ref_forward(x, w, b)
    assert out.shape == (B,), out.shape
    assert jnp.allclose(out, expected, atol=1e-4, rtol=1e-4), (out, expected)
    print("KERNEL_OK")
</pallas_src>

<mosaic_0001>
module attributes {stable_mosaic.version = 11 : i64} {
  func.func @cnn_text_kernel(%arg0: i32, %arg1: memref<8x16x50xf32, #tpu.memory_space<vmem>>, %arg2: memref<5x50xf32, #tpu.memory_space<vmem>>, %arg3: memref<1x1xf32, #tpu.memory_space<smem>>, %arg4: memref<8x1xf32, #tpu.memory_space<vmem>>) attributes {dimension_semantics = [#tpu.dimension_semantics<parallel>], iteration_bounds = array<i64: 1>, scalar_prefetch = 0 : i64, scratch_operands = 0 : i64, tpu.core_type = #tpu.core_type<tc>, window_params = [{transform_indices = @transform_0, window_bounds = array<i64: 8, 16, 50>}, {pipeline_mode = #tpu.pipeline_mode<synchronous>, transform_indices = @transform_1, window_bounds = array<i64: 5, 50>}, {transform_indices = @transform_2, window_bounds = array<i64: 1, 1>}, {transform_indices = @transform_3, window_bounds = array<i64: 8, 1>}]} {
    %c0 = arith.constant 0 : index
    %c0_0 = arith.constant 0 : index
    %c0_1 = arith.constant 0 : index
    %0 = vector.load %arg1[%c0, %c0_0, %c0_1] : memref<8x16x50xf32, #tpu.memory_space<vmem>>, vector<8x16x50xf32>
    %1 = vector.shape_cast %0 : vector<8x16x50xf32> to vector<128x50xf32>
    %c0_2 = arith.constant 0 : index
    %c0_3 = arith.constant 0 : index
    %2 = vector.load %arg2[%c0_2, %c0_3] : memref<5x50xf32, #tpu.memory_space<vmem>>, vector<5x50xf32>
    %cst = arith.constant dense<0.000000e+00> : vector<5x128xf32>
    %3 = tpu.matmul %2, %1, %cst {dimension_numbers = #tpu.dot_dimension_numbers<[1], [1], [0], [0], [0, 0, 1, 0], [], []>} : vector<5x50xf32>, vector<128x50xf32>, vector<5x128xf32> -> vector<5x128xf32>
    %4 = vector.shape_cast %3 : vector<5x128xf32> to vector<5x8x16xf32>
    %5 = vector.extract_strided_slice %4 {offsets = [0, 0, 0], sizes = [1, 8, 12], strides = [1, 1, 1]} : vector<5x8x16xf32> to vector<1x8x12xf32>
    %6 = vector.shape_cast %5 : vector<1x8x12xf32> to vector<8x12xf32>
    %7 = vector.extract_strided_slice %4 {offsets = [1, 0, 1], sizes = [1, 8, 12], strides = [1, 1, 1]} : vector<5x8x16xf32> to vector<1x8x12xf32>
    %8 = vector.shape_cast %7 : vector<1x8x12xf32> to vector<8x12xf32>
    %9 = arith.addf %6, %8 : vector<8x12xf32>
    %10 = vector.extract_strided_slice %4 {offsets = [2, 0, 2], sizes = [1, 8, 12], strides = [1, 1, 1]} : vector<5x8x16xf32> to vector<1x8x12xf32>
    %11 = vector.shape_cast %10 : vector<1x8x12xf32> to vector<8x12xf32>
    %12 = arith.addf %9, %11 : vector<8x12xf32>
    %13 = vector.extract_strided_slice %4 {offsets = [3, 0, 3], sizes = [1, 8, 12], strides = [1, 1, 1]} : vector<5x8x16xf32> to vector<1x8x12xf32>
    %14 = vector.shape_cast %13 : vector<1x8x12xf32> to vector<8x12xf32>
    %15 = arith.addf %12, %14 : vector<8x12xf32>
    %16 = vector.extract_strided_slice %4 {offsets = [4, 0, 4], sizes = [1, 8, 12], strides = [1, 1, 1]} : vector<5x8x16xf32> to vector<1x8x12xf32>
    %17 = vector.shape_cast %16 : vector<1x8x12xf32> to vector<8x12xf32>
    %18 = arith.addf %15, %17 : vector<8x12xf32>
    %c0_4 = arith.constant 0 : index
    %c0_5 = arith.constant 0 : index
    %19 = memref.load %arg3[%c0_4, %c0_5] : memref<1x1xf32, #tpu.memory_space<smem>>
    %20 = vector.broadcast %19 : f32 to vector<8x12xf32>
    %21 = arith.addf %18, %20 : vector<8x12xf32>
    %cst_6 = arith.constant 0.000000e+00 : f32
    %22 = vector.broadcast %cst_6 : f32 to vector<8x12xf32>
    %23 = arith.maximumf %21, %22 : vector<8x12xf32>
    %cst_7 = arith.constant dense<0xFF800000> : vector<8xf32>
    %24 = vector.multi_reduction <maximumf>, %23, %cst_7 [1] : vector<8x12xf32> to vector<8xf32>
    %25 = vector.shape_cast %24 : vector<8xf32> to vector<8x1xf32>
    %c0_8 = arith.constant 0 : index
    %c0_9 = arith.constant 0 : index
    %26 = vector.load %arg4[%c0_8, %c0_9] : memref<8x1xf32, #tpu.memory_space<vmem>>, vector<8x1xf32>
    tpu.vector_store %arg4[%c0_8, %c0_9], %25 {strides = array<i32>} : memref<8x1xf32, #tpu.memory_space<vmem>>, vector<8x1xf32>,
    return
  }
  func.func @transform_0(%arg0: i32) -> (i32, i32, i32) {
    %c0_i32 = arith.constant 0 : i32
    %c0_i32_0 = arith.constant 0 : i32
    %c0_i32_1 = arith.constant 0 : i32
    return %arg0, %c0_i32, %c0_i32_0 : i32, i32, i32
  }
  func.func @transform_1(%arg0: i32) -> (i32, i32) {
    %c0_i32 = arith.constant 0 : i32
    %c0_i32_0 = arith.constant 0 : i32
    %c0_i32_1 = arith.constant 0 : i32
    return %c0_i32, %c0_i32_0 : i32, i32
  }
  func.func @transform_2(%arg0: i32) -> (i32, i32) {
    %c0_i32 = arith.constant 0 : i32
    %c0_i32_0 = arith.constant 0 : i32
    %c0_i32_1 = arith.constant 0 : i32
    return %c0_i32, %c0_i32_0 : i32, i32
  }
  func.func @transform_3(%arg0: i32) -> (i32, i32) {
    %c0_i32 = arith.constant 0 : i32
    %c0_i32_0 = arith.constant 0 : i32
    return %arg0, %c0_i32 : i32, i32
  }
}

</mosaic_0001>

<bundles_post_ra>
// kernel: tpu_custom_call.1
= control target key start
LH: loop header
LB: loop body
LE: loop exit
PB: predicated region body
PF: predicated region fallthrough
CT: control target
= control target key end

     0   :  { %9 = vsyncpa [#allocation4], 0  ;;  %s617_s0 = inlined_call_operand.hbm [shape: f32[8,16,50], index: 0, kind: input, shape index: {}]   ;;  %s618_s1 = inlined_call_operand.hbm [shape: f32[5,50], index: 1, kind: input, shape index: {}]   ;;  %s619_s2 = inlined_call_operand.<no memory space> [shape: f32[1,1], index: 2, kind: input, shape index: {}]   ;;  %s620_s3 = inlined_call_operand.vmem [shape: f32[8,1], index: 3, kind: output, shape index: {}]  }
   0x1   :  { %10 = vsyncpa [#allocation6], 0  ;;  %s524_s12 = smov [#allocation3]   ;;  %s476_s16 = scalar_lea.hbm %s617_s0, 2048 }
   0x2   :  { %s16_s13 = sshll.u32 %s524_s12, 4  ;;  %p477_p0 = scmp.ne.s32.totalorder %s617_s0, %s476_s16  ;;  %s17_s13 = int_to_ptr.vmem [resolvable:$true] %s16_s13 }
   0x3   :  { %p480_p1 = scmp.lt.u32.totalorder %s476_s16, %s617_s0 }
   0x5   :  { %p482_p2 = pnand %p480_p1, %p477_p0 }
   0x7   :  { %485 = shalt.err (!%p482_p2)
}
   0x8   :  { %s486_s21 = scalar_lea.vmem %s17_s13, 2048  ;;  %p491_p4 = scmp.lt.s32.totalorder %s17_s13, %s17_s13 }
   0x9   :  { %p487_p3 = scmp.ne.s32.totalorder %s17_s13, %s486_s21  ;;  %p492_p5 = scmp.lt.s32.totalorder %s486_s21, %s486_s21 }
   0xb   :  { %p493_p6 = por %p492_p5, %p491_p4 }
   0xd   :  { %p494_p7 = pnand %p493_p6, %p487_p3 }
   0xf   :  { %497 = shalt.err (!%p494_p7)
}
  0x10   :  { %s525_s22 = smov 128   ;;  %s526_s23 = smov 8  }
  0x11   :  { %22 = dma.hbm_to_vmem [thread:$0]  %s617_s0, 2048, %s17_s13, [#allocation4], %s525_s22, %s525_s22, %s526_s23  }
  0x12   :  { %s527_s26 = smov [#allocation5]   ;;  %s498_s30 = scalar_lea.hbm %s618_s1, 128 }
  0x13   :  { %s29_s27 = sshll.u32 %s527_s26, 4  ;;  %p499_p8 = scmp.ne.s32.totalorder %s618_s1, %s498_s30  ;;  %s30_s27 = int_to_ptr.vmem [resolvable:$true] %s29_s27 }
  0x14   :  { %p502_p9 = scmp.lt.u32.totalorder %s498_s30, %s618_s1 }
  0x16   :  { %p504_p10 = pnand %p502_p9, %p499_p8 }
  0x18   :  { %507 = shalt.err (!%p504_p10)
}
  0x19   :  { %s508_s8 = scalar_lea.vmem %s30_s27, 128  ;;  %p513_p12 = scmp.lt.s32.totalorder %s30_s27, %s30_s27 }
  0x1a   :  { %p509_p11 = scmp.ne.s32.totalorder %s30_s27, %s508_s8  ;;  %p514_p13 = scmp.lt.s32.totalorder %s508_s8, %s508_s8 }
  0x1c   :  { %p515_p0 = por %p514_p13, %p513_p12 }
  0x1e   :  { %p516_p1 = pnand %p515_p0, %p509_p11 }
  0x20   :  { %519 = shalt.err (!%p516_p1)
}
  0x21   :  { %32 = dma.hbm_to_vmem [thread:$0]  %s618_s1, 128, %s30_s27, [#allocation6]  }
  0x22   :  { %520 = dma.done.wait [#allocation4], 2048  }
  0x23   :  { %521 = vsyncadd [#allocation4], 4294965248 }
  0x24   :  { %522 = dma.done.wait [#allocation6], 128  }
  0x25   :  { %523 = vsyncadd [#allocation6], 4294967168  ;;  %v528_v0 = vmov 0.0|0.0   ;;  %vm529_vm0 = vmmov 0   ;;  %v530_v1 = vmov 0.0   ;;  %vm58_vm1 = vcmask 408576  }
  0x26   :  { %424 = vmatprep.subr.bf16.mxu0 %v528_v0  ;;  %421 = vmatprep.mubr.msk.f32.mxu0 %vm529_vm0, %v530_v1  ;;  %v41_v2 = vld [vmem:[#allocation3] sm:$0xff]  ;;  %v42_v3 = vld [vmem:[#allocation3 + $0x8] sm:$0xff]  ;;  %vm590_vm2 = vmpackc.low %vm58_vm1, %vm58_vm1  ;;  %s531_s1 = smov 80   ;;  %s532_s10 = smov 112   ;;  %v538_v31 = vmov 1983009808   ;;  %v207_v33 = vlaneseq }
  0x27   :  { %v425_v5 = vpack.c.bf16 %v42_v3, %v41_v2  ;;  %v43_v6 = vld [vmem:[#allocation3 + $0x10] sm:$0xff]  ;;  %v44_v7 = vld [vmem:[#allocation3 + $0x18] sm:$0xff]  ;;  %v45_v9 = vld [vmem:[#allocation3 + $0x20] sm:$0xff]  ;;  %s533_s11 = smov 64   ;;  %s534_s12 = smov 96   ;;  %v205_v32 = vunpack.c.l.s4 %v538_v31  ;;  %vm343_vm3 = vcmask 97280  }
  0x28   :  { %v429_v8 = vpack.c.bf16 %v44_v7, %v43_v6  ;;  %v46_v10 = vld [vmem:[#allocation3 + $0x28] sm:$0xff]  ;;  %v47_v12 = vld [vmem:[#allocation3 + $0x30] sm:$0xff]  ;;  %v48_v13 = vld [vmem:[#allocation3 + $0x38] sm:$0xff]  ;;  %s535_s13 = smov 32   ;;  %s536_s14 = smov 48   ;;  %v208_v36 = vshrl.u32 %v207_v33, 7 }
  0x29   :  { %427 = vmatpush3.bf16.xpose.msk.msra.mxu0 %vm590_vm2, %v425_v5  ;;  %v433_v11 = vpack.c.bf16 %v46_v10, %v45_v9  ;;  %v437_v14 = vpack.c.bf16 %v48_v13, %v47_v12  ;;  %v49_v15 = vld [vmem:[#allocation3 + $0x40] sm:$0xff]  ;;  %v50_v16 = vld [vmem:[#allocation3 + $0x48] sm:$0xff]  ;;  %v51_v18 = vld [vmem:[#allocation3 + $0x50] sm:$0xff]  ;;  %s537_s15 = smov 16   ;;  %v206_v35 = vunpack.c.0.s8 %v205_v32  ;;  %v539_v40 = vmov 1934713408  }
  0x2a   :  { %428 = vmatprep.subr.bf16.mxu0 %v528_v0  ;;  %v441_v17 = vpack.c.bf16 %v50_v16, %v49_v15  ;;  %v52_v19 = vld [vmem:[#allocation3 + $0x58] sm:$0xff]  ;;  %v53_v21 = vld [vmem:[#allocation3 + $0x60] sm:$0xff]  ;;  %v54_v22 = vld [vmem:[#allocation3 + $0x68] sm:$0xff]  ;;  %v269_v41 = vunpack.c.l.s4 %v539_v40  ;;  %s540_s16 = smov 126   ;;  %s541_s17 = smov 127   ;;  %vm347_vm4 = vcmask 7168  }
  0x2b   :  { %v445_v20 = vpack.c.bf16 %v52_v19, %v51_v18  ;;  %v449_v23 = vpack.c.bf16 %v54_v22, %v53_v21  ;;  %v55_v24 = vld [vmem:[#allocation3 + $0x70] sm:$0xff]  ;;  %v56_v25 = vld [vmem:[#allocation3 + $0x78] sm:$0xff]  ;;  %v57_v27 = vld [vmem:[#allocation5] sm:$0x1f]  ;;  %v209_v42 = vsub.s32 %v206_v35, %v208_v36  ;;  %s542_s18 = smov 124   ;;  %s543_s19 = smov 125  }
  0x2c   :  { %v453_v26 = vpack.c.bf16 %v56_v25, %v55_v24  ;;  %v270_v48 = vunpack.c.0.s8 %v269_v41 }
  0x2e   :  { %v273_v59 = vsub.s32 %v270_v48, %v208_v36 }
  0x31   :  { %431 = vmatpush3.bf16.xpose.msk.msra.mxu0 %vm590_vm2, %v429_v8 }
  0x32   :  { %432 = vmatprep.subr.bf16.mxu0 %v528_v0 }
  0x39   :  { %435 = vmatpush3.bf16.xpose.msk.msra.mxu0 %vm590_vm2, %v433_v11 }
  0x3a   :  { %436 = vmatprep.subr.bf16.mxu0 %v528_v0 }
  0x41   :  { %439 = vmatpush3.bf16.xpose.msk.msra.mxu0 %vm590_vm2, %v437_v14 }
  0x42   :  { %440 = vmatprep.subr.bf16.mxu0 %v528_v0 }
  0x49   :  { %443 = vmatpush3.bf16.xpose.msk.msra.mxu0 %vm590_vm2, %v441_v17 }
  0x4a   :  { %444 = vmatprep.subr.bf16.mxu0 %v528_v0 }
  0x51   :  { %447 = vmatpush3.bf16.xpose.msk.msra.mxu0 %vm590_vm2, %v445_v20 }
  0x52   :  { %448 = vmatprep.subr.bf16.mxu0 %v528_v0 }
  0x59   :  { %451 = vmatpush3.bf16.xpose.msk.msra.mxu0 %vm590_vm2, %v449_v23  ;;  %v340_v23 = vstv %s619_s2 }
  0x5a   :  { %452 = vmatprep.subr.bf16.mxu0 %v528_v0 }
  0x61   :  { %455 = vmatpush3.bf16.xpose.msk.msra.mxu0 %vm590_vm2, %v453_v26 }
  0x68   :  { %422 = vmatmul.mubr.msk.f32.vlgmr.msra.gmra.mrb[0].mxu0 %vm58_vm1, %v57_v27 }
 0x13b   :  { %v176_v28 = vpop.f32.mrb[0].mxu0 }
 0x13c   :  { %187 = vrot.lane.b32.xlu1 %v176_v28, %s531_s1  ;;  %181 = vrot.lane.b32.xlu0 %v176_v28, %s532_s10  ;;  %v423_v29 = vpop.f32.mrb[1].mxu0 }
 0x140   :  { %190 = vrot.lane.b32.xlu1 %v176_v28, %s533_s11  ;;  %184 = vrot.lane.b32.xlu0 %v176_v28, %s534_s12 }
 0x144   :  { %196 = vrot.lane.b32.xlu1 %v176_v28, %s535_s13  ;;  %193 = vrot.lane.b32.xlu0 %v176_v28, %s536_s14 }
 0x148   :  { %199 = vrot.lane.b32.xlu0 %v176_v28, %s537_s15 }
 0x1ae   :  { %v188_v30 = vpop.permute.xlu1 %187  ;;  %v182_v34 = vpop.permute.xlu0 %181 }
 0x1af   :  { %v218_v43 = vcombine.low %v182_v34, %v188_v30  ;;  %v219_v51 = vcombine.high %v182_v34, %v188_v30 }
 0x1b1   :  { %v226_v52 = vrot.slane %v218_v43, %v209_v42  ;;  %v233_v0 = vrot.slane %v219_v51, %v209_v42 }
 0x1b2   :  { %v191_v37 = vpop.permute.xlu1 %190  ;;  %v185_v38 = vpop.permute.xlu0 %184 }
 0x1b3   :  { %v202_v39 = vcombine.low %v176_v28, %v185_v38  ;;  %v203_v46 = vcombine.high %v176_v28, %v185_v38 }
 0x1b5   :  { %v210_v47 = vrot.slane %v202_v39, %v209_v42  ;;  %v217_v56 = vrot.slane %v203_v46, %v209_v42 }
 0x1b6   :  { %v197_v44 = vpop.permute.xlu1 %196  ;;  %v194_v45 = vpop.permute.xlu0 %193 }
 0x1b7   :  { %v234_v49 = vcombine.low %v191_v37, %v197_v44  ;;  %v235_v50 = vcombine.high %v191_v37, %v197_v44  ;;  %v266_v57 = vcombine.low %v210_v47, %v226_v52  ;;  %v267_v58 = vcombine.high %v210_v47, %v226_v52 }
 0x1b8   :  { %v282_v4 = vcombine.low %v217_v56, %v233_v0 }
 0x1b9   :  { %v242_v60 = vrot.slane %v234_v49, %v209_v42  ;;  %v249_v61 = vrot.slane %v235_v50, %v209_v42  ;;  %v281_v5 = vrot.slane %v267_v58, %v273_v59  ;;  %v274_v7 = vrot.slane %v266_v57, %v273_v59 }
 0x1ba   :  { %v200_v53 = vpop.permute.xlu0 %199  ;;  %v289_v13 = vrot.slane %v282_v4, %v273_v59 }
 0x1bb   :  { %v250_v54 = vcombine.low %v194_v45, %v200_v53  ;;  %v251_v55 = vcombine.high %v194_v45, %v200_v53 }
 0x1bd   :  { %v258_v62 = vrot.slane %v250_v54, %v209_v42  ;;  %v265_v63 = vrot.slane %v251_v55, %v209_v42 }
 0x1bf   :  { %v290_v1 = vcombine.low %v242_v60, %v258_v62  ;;  %v291_v2 = vcombine.high %v242_v60, %v258_v62  ;;  %v306_v3 = vcombine.low %v249_v61, %v265_v63 }
 0x1c1   :  { %v305_v6 = vrot.slane %v291_v2, %v273_v59  ;;  %v298_v8 = vrot.slane %v290_v1, %v273_v59  ;;  %v313_v11 = vrot.slane %v306_v3, %v273_v59 }
 0x1c3   :  { %v316_v9 = vcombine.low %v281_v5, %v305_v6  ;;  %v315_v10 = vcombine.high %v274_v7, %v298_v8  ;;  %v314_v12 = vcombine.low %v274_v7, %v298_v8  ;;  %v318_v14 = vcombine.low %v289_v13, %v313_v11 }
 0x1c4   :  { %v317_v15 = vcombine.high %v281_v5, %v305_v6 }
 0x1c5   :  { %325 = vrot.lane.b32.xlu0 %v316_v9, %s540_s16  ;;  %320 = vrot.lane.b32.xlu1 %v315_v10, %s541_s17 }
 0x1c9   :  { %335 = vrot.lane.b32.xlu0 %v318_v14, %s542_s18  ;;  %330 = vrot.lane.b32.xlu1 %v317_v15, %s543_s19 }
 0x237   :  { %v326_v16 = vpop.permute.xlu0 %325  ;;  %v321_v17 = vpop.permute.xlu1 %320 }
 0x238   :  { %v323_v18 = vadd.f32 %v321_v17, %v314_v12 }
 0x23a   :  { %v328_v19 = vadd.f32 %v326_v16, %v323_v18 }
 0x23b   :  { %v331_v20 = vpop.permute.xlu1 %330  ;;  %v336_v22 = vpop.permute.xlu0 %335 }
 0x23c   :  { %v333_v21 = vadd.f32 %v331_v20, %v328_v19 }
 0x23e   :  { %v338_v24 = vadd.f32 %v336_v22, %v333_v21 }
 0x240   :  { %v341_v25 = vadd.f32 %v340_v23, %v338_v24 }
 0x242   :  { %v342_v26 = vmax.f32 %v341_v25, 0.0 }
 0x244   :  { %v344_v27 = vsel %vm343_vm3, %v342_v26, -inf }
 0x245   :  { %345 = vmax.xlane.f32.xlu1 %v344_v27 }
 0x2d2   :  { %v346_v28 = vpop.xlane.xlu1 %345 }
 0x2d3   :  { %348 = vst.msk [vmem:[%s620_s3] sm:$0xff] %vm347_vm4, %v346_v28 }
 0x2d4   :  { %353 = vsyncpa [#allocation4], 1 }
 0x2d5   :  { %354 = vsyncpa [#allocation6], 1 }

</bundles_post_ra>
